<compile_context>
chip_gen: v7x
topology: tpu7x:2x2x1
jax: 0.10.0
libtpu: 0.0.40
codegen_flags: <defaults>
</compile_context>

<pallas_src>
import functools

import jax
import jax.numpy as jnp
import numpy as np
from jax.experimental import pallas as pl
from jax.experimental.pallas import tpu as pltpu


NUM_CLASSES = 1000

# (out_ch, in_ch, kh, kw, stride, pad)
CONV_CFG = [
    (64, 3, 11, 11, 4, 2),
    (192, 64, 5, 5, 1, 2),
    (384, 192, 3, 3, 1, 1),
    (256, 384, 3, 3, 1, 1),
    (256, 256, 3, 3, 1, 1),
]
# (in_features, out_features)
FC_CFG = [(256 * 6 * 6, 4096), (4096, 4096), (4096, NUM_CLASSES)]

_MAX_TK = 4096          # single-K up to 4096 (8 MiB bf16 weight block at tn=1024)
_MAX_TM = 512


def _round_up(x, m):
    return ((x + m - 1) // m) * m


@functools.lru_cache(maxsize=1)
def _vmem_limit_bytes():
    """Per-chip scoped-VMEM budget (review: 64 MiB on v5e/v6e, ~40 MiB on v7x)."""
    try:
        cap = pltpu.get_tpu_info().vmem_capacity_bytes
    except Exception:
        return 32 * 1024 * 1024
    if cap >= 100 * 1024 * 1024:      # v5e / v6e: 128 MiB physical
        return 64 * 1024 * 1024
    return 40 * 1024 * 1024           # v7x: 64 MiB physical


def _kn_plan(K, N):
    """Tile plan along K / N (shared by init-time weight packing and runtime)."""
    if K <= _MAX_TK:
        tk, n_k, Kp = K, 1, K                     # single K step, no K padding
    else:
        n_k = -(-K // _MAX_TK)
        tk = _round_up(-(-K // n_k), 128)
        Kp = tk * n_k
    tn = min(1024, _round_up(N, 128))
    Np = _round_up(N, tn)
    return tk, n_k, Kp, tn, Np


# ----------------------------------------------------------------------------
# Pallas kernels: tiled matmul with fused bias + optional ReLU
# ----------------------------------------------------------------------------
def _mm_bias_act_1k_kernel(x_ref, w_ref, b_ref, o_ref, *, relu):
    """Single K step: y = x @ w + b (ReLU optional), f32 accumulate, cast on store."""
    acc = jnp.dot(x_ref[...], w_ref[...], preferred_element_type=jnp.float32)
    acc = acc + b_ref[...]
    if relu:
        acc = jnp.maximum(acc, 0.0)
    o_ref[...] = acc.astype(o_ref.dtype)


def _mm_bias_act_kernel(x_ref, w_ref, b_ref, o_ref, acc_ref, *, relu):
    """Multi K step: f32 VMEM scratch accumulator; first step stores the dot
    directly; bias/ReLU folded into the last step; output written once."""
    k = pl.program_id(2)
    prod = jnp.dot(x_ref[...], w_ref[...], preferred_element_type=jnp.float32)

    @pl.when(k == 0)
    def _():
        acc_ref[...] = prod

    @pl.when(k > 0)
    def _():
        acc_ref[...] += prod

    @pl.when(k == pl.num_programs(2) - 1)
    def _():
        out = acc_ref[...] + b_ref[...]          # (tm, tn) + (1, tn)
        if relu:
            out = jnp.maximum(out, 0.0)
        o_ref[...] = out.astype(o_ref.dtype)


def matmul_bias_act(x, w_pad, b_pad, *, n_out, relu, out_dtype=jnp.bfloat16):
    """y = x @ W + b (optionally ReLU).

    x:      (M, K)  any float dtype (bf16 is a no-op cast).
    w_pad:  (Kp, Np) bf16, pre-padded/cast ONCE at init via _prep_matmul_weight.
    b_pad:  (1, Np)  f32, pre-padded at init.
    Returns (M, n_out) in out_dtype (bf16 for hidden layers, f32 for logits).
    """
    M, K = x.shape
    tk, n_k, Kp, tn, Np = _kn_plan(K, n_out)
    assert w_pad.shape == (Kp, Np), (w_pad.shape, (Kp, Np))
    assert b_pad.shape == (1, Np), (b_pad.shape, (1, Np))

    if M <= _MAX_TM:
        tm, n_i, Mp = M, 1, M                    # full-dim waiver -> no M pad
    else:
        n_i = -(-M // _MAX_TM)
        tm = _round_up(-(-M // n_i), 16)         # bf16 sublane packing
        Mp = tm * n_i

    # v7x has 2 TensorCores: make sure at least one "parallel" axis has >1 block
    # (no-op loss on 1-TC chips: grid steps double but each stays large).
    if n_i == 1 and Np == tn and tn % 256 == 0:
        tn //= 2
    n_j = Np // tn

    xb = x.astype(jnp.bfloat16)
    if (Mp, Kp) != (M, K):
        xb = jnp.pad(xb, ((0, Mp - M), (0, Kp - K)))

    cost = pl.CostEstimate(
        flops=2 * Mp * Kp * Np,
        transcendentals=0,
        bytes_accessed=(xb.size * 2 + w_pad.size * 2 + b_pad.size * 4
                        + Mp * Np * jnp.dtype(out_dtype).itemsize),
    )

    if n_k == 1:
        grid = (n_i, n_j)
        in_specs = [
            pl.BlockSpec((tm, Kp), lambda i, j: (i, 0)),
            pl.BlockSpec((Kp, tn), lambda i, j: (0, j)),
            pl.BlockSpec((1, tn), lambda i, j: (0, j)),
        ]
        out_specs = pl.BlockSpec((tm, tn), lambda i, j: (i, j))
        kernel = functools.partial(_mm_bias_act_1k_kernel, relu=relu)
        dims = ("parallel", "parallel")
        scratch = []
    else:
        grid = (n_i, n_j, n_k)
        in_specs = [
            pl.BlockSpec((tm, tk), lambda i, j, k: (i, k)),
            pl.BlockSpec((tk, tn), lambda i, j, k: (k, j)),
            pl.BlockSpec((1, tn), lambda i, j, k: (0, j)),
        ]
        out_specs = pl.BlockSpec((tm, tn), lambda i, j, k: (i, j))
        kernel = functools.partial(_mm_bias_act_kernel, relu=relu)
        dims = ("parallel", "parallel", "arbitrary")
        scratch = [pltpu.VMEM((tm, tn), jnp.float32)]

    out = pl.pallas_call(
        kernel,
        out_shape=jax.ShapeDtypeStruct((Mp, Np), out_dtype),
        grid_spec=pltpu.PrefetchScalarGridSpec(
            num_scalar_prefetch=0,
            grid=grid,
            in_specs=in_specs,
            out_specs=out_specs,
            scratch_shapes=scratch,
        ),
        compiler_params=pltpu.CompilerParams(
            dimension_semantics=dims,
            vmem_limit_bytes=_vmem_limit_bytes(),
        ),
        cost_estimate=cost,
    )(xb, w_pad, b_pad)

    if Mp != M or Np != n_out:
        out = out[:M, :n_out]
    return out


# ----------------------------------------------------------------------------
# Conv2d via NHWC bf16 patch-extraction + Pallas matmul
# ----------------------------------------------------------------------------
def conv2d_relu(x_nhwc, w_pad, b_pad, *, kh, kw, stride, padding, n_out, relu=True):
    """x: (N,H,W,C) bf16 -> (N,OH,OW,n_out) bf16; weights pre-packed at init."""
    N = x_nhwc.shape[0]
    # Patches come out channel-major (C slowest, then kh, kw) — same ordering
    # as PyTorch's w.reshape(O, C*KH*KW), which is how the weights were packed.
    # Validated once in __main__ against jax.lax.conv_general_dilated.
    patches = jax.lax.conv_general_dilated_patches(
        x_nhwc, (kh, kw), (stride, stride),
        padding=((padding, padding), (padding, padding)),
        dimension_numbers=("NHWC", "HWIO", "NHWC"),
    )  # (N, OH, OW, C*kh*kw), bf16
    _, OH, OW, KC = patches.shape
    col = patches.reshape(N * OH * OW, KC)
    y = matmul_bias_act(col, w_pad, b_pad, n_out=n_out, relu=relu,
                        out_dtype=jnp.bfloat16)
    return y.reshape(N, OH, OW, n_out)


def maxpool2d_nhwc(x, k=3, s=2):
    # PyTorch MaxPool2d(kernel_size=3, stride=2), ceil_mode=False -> VALID.
    return jax.lax.reduce_window(
        x, jnp.array(-jnp.inf, x.dtype), jax.lax.max,
        (1, k, k, 1), (1, s, s, 1), "VALID")


def adaptive_avg_pool2d_nhwc(x, out_hw=(6, 6)):
    N, H, W, C = x.shape
    OH, OW = out_hw
    xf = x.astype(jnp.float32)      # tiny tensor; average in f32, return bf16
    rows = []
    for i in range(OH):
        h0 = (i * H) // OH
        h1 = -(-((i + 1) * H) // OH)
        cols = []
        for j in range(OW):
            w0 = (j * W) // OW
            w1 = -(-((j + 1) * W) // OW)
            cols.append(jnp.mean(xf[:, h0:h1, w0:w1, :], axis=(1, 2)))  # (N, C)
        rows.append(jnp.stack(cols, axis=1))   # (N, OW, C)
    return jnp.stack(rows, axis=1).astype(x.dtype)  # (N, OH, OW, C)


# ----------------------------------------------------------------------------
# Parameters: deterministic synthetic init, pre-packed for the kernel
# ----------------------------------------------------------------------------
def _prep_matmul_weight(w2d, b, K, N):
    """Pad to the kernel's (Kp, Np) plan and cast the weight to bf16 once."""
    _, _, Kp, _, Np = _kn_plan(K, N)
    wp = jnp.pad(w2d.astype(jnp.float32),
                 ((0, Kp - K), (0, Np - N))).astype(jnp.bfloat16)
    bp = jnp.pad(b, (0, Np - N)).astype(jnp.float32).reshape(1, Np)
    return wp, bp


def init_params(key, num_classes=NUM_CLASSES):
    params = {}
    keys = jax.random.split(key, len(CONV_CFG) + len(FC_CFG))
    for idx, (o, c, kh, kw, _s, _p) in enumerate(CONV_CFG):
        w = 0.02 * jax.random.normal(keys[idx], (o, c, kh, kw), jnp.float32)
        b = jnp.zeros((o,), jnp.float32)
        w2d = w.reshape(o, c * kh * kw).T        # (C*KH*KW, O), channel-major
        wp, bp = _prep_matmul_weight(w2d, b, c * kh * kw, o)
        params[f"conv{idx}_w"] = wp
        params[f"conv{idx}_b"] = bp
    for idx, (kin, kout) in enumerate(FC_CFG):
        kout = num_classes if idx == len(FC_CFG) - 1 else kout
        w = 0.02 * jax.random.normal(keys[len(CONV_CFG) + idx], (kin, kout),
                                     jnp.float32)
        b = jnp.zeros((kout,), jnp.float32)
        wp, bp = _prep_matmul_weight(w, b, kin, kout)
        params[f"fc{idx}_w"] = wp
        params[f"fc{idx}_b"] = bp
    return params


# ----------------------------------------------------------------------------
# Forward pass (mirrors AlexNet.forward; NHWC + bf16 internally)
# ----------------------------------------------------------------------------
def alexnet_forward(params, x_nchw):
    x = jnp.transpose(x_nchw, (0, 2, 3, 1)).astype(jnp.bfloat16)  # NCHW->NHWC once
    for li, (o, _c, kh, kw, stride, pad) in enumerate(CONV_CFG):
        x = conv2d_relu(x, params[f"conv{li}_w"], params[f"conv{li}_b"],
                        kh=kh, kw=kw, stride=stride, padding=pad, n_out=o)
        if li in (0, 1, 4):
            x = maxpool2d_nhwc(x)
    x = adaptive_avg_pool2d_nhwc(x, (6, 6))                      # (N, 6, 6, 256)
    # Match torch.flatten on NCHW (tiny tensor; negligible cost).
    x = jnp.transpose(x, (0, 3, 1, 2)).reshape(x.shape[0], -1)   # (N, 9216)
    # classifier (Dropout == identity in inference mode)
    x = matmul_bias_act(x, params["fc0_w"], params["fc0_b"], n_out=4096, relu=True)
    x = matmul_bias_act(x, params["fc1_w"], params["fc1_b"], n_out=4096, relu=True)
    x = matmul_bias_act(x, params["fc2_w"], params["fc2_b"],
                        n_out=NUM_CLASSES, relu=False, out_dtype=jnp.float32)
    return x


# ----------------------------------------------------------------------------
# One-time validation of patch ordering vs jax.lax.conv_general_dilated
# ----------------------------------------------------------------------------
def _validate_conv0(params, x_nchw):
    o, c, kh, kw, s, p = CONV_CFG[0]
    x = jnp.transpose(x_nchw, (0, 2, 3, 1)).astype(jnp.bfloat16)
    got = conv2d_relu(x, params["conv0_w"], params["conv0_b"],
                      kh=kh, kw=kw, stride=s, padding=p, n_out=o)
    w2d = params["conv0_w"][:, :o].astype(jnp.float32)            # (C*KH*KW, O)
    w_hwio = w2d.reshape(c, kh, kw, o).transpose(1, 2, 0, 3)       # (KH, KW, C, O)
    ref = jax.lax.conv_general_dilated(
        x.astype(jnp.float32), w_hwio, (s, s), ((p, p), (p, p)),
        dimension_numbers=("NHWC", "HWIO", "NHWC"))
    ref = jnp.maximum(ref + params["conv0_b"][0, :o], 0.0)
    np.testing.assert_allclose(np.asarray(got.astype(jnp.float32)),
                               np.asarray(ref), rtol=2e-2, atol=2e-2)


if __name__ == "__main__":
    key = jax.random.PRNGKey(0)
    k_param, k_x = jax.random.split(key)
    params = init_params(k_param, num_classes=NUM_CLASSES)
    # Small input (batch=2, 3x64x64) — small enough to run quickly while
    # exercising every layer of the module.
    x = jax.random.normal(k_x, (2, 3, 64, 64), jnp.float32)

    _validate_conv0(params, x)   # patch-ordering / conv-path correctness check

    fwd = jax.jit(alexnet_forward)
    out = jax.block_until_ready(fwd(params, x))
    assert out.shape == (2, NUM_CLASSES), out.shape
    assert jnp.all(jnp.isfinite(out))
    print("KERNEL_OK")
</pallas_src>

<mosaic_0001>
module attributes {stable_mosaic.version = 11 : i64} {
  func.func @_mm_bias_act_1k_kernel(%arg0: i32, %arg1: i32, %arg2: memref<450x363xbf16, #tpu.memory_space<vmem>>, %arg3: memref<363x128xbf16, #tpu.memory_space<vmem>>, %arg4: memref<1x128xf32, #tpu.memory_space<vmem>>, %arg5: memref<450x128xbf16, #tpu.memory_space<vmem>>) attributes {dimension_semantics = [#tpu.dimension_semantics<parallel>, #tpu.dimension_semantics<parallel>], iteration_bounds = array<i64: 1, 1>, scalar_prefetch = 0 : i64, scratch_operands = 0 : i64, tpu.core_type = #tpu.core_type<tc>, window_params = [{transform_indices = @transform_0, window_bounds = array<i64: 450, 363>}, {transform_indices = @transform_1, window_bounds = array<i64: 363, 128>}, {transform_indices = @transform_2, window_bounds = array<i64: 1, 128>}, {transform_indices = @transform_3, window_bounds = array<i64: 450, 128>}]} {
    %c0 = arith.constant 0 : index
    %c0_0 = arith.constant 0 : index
    %0 = vector.load %arg2[%c0, %c0_0] : memref<450x363xbf16, #tpu.memory_space<vmem>>, vector<450x363xbf16>
    %c0_1 = arith.constant 0 : index
    %c0_2 = arith.constant 0 : index
    %1 = vector.load %arg3[%c0_1, %c0_2] : memref<363x128xbf16, #tpu.memory_space<vmem>>, vector<363x128xbf16>
    %cst = arith.constant dense<0.000000e+00> : vector<450x128xf32>
    %2 = tpu.matmul %0, %1, %cst {dimension_numbers = #tpu.dot_dimension_numbers<[1], [0], [0], [1], [0, 0, 1, 1], [], []>} : vector<450x363xbf16>, vector<363x128xbf16>, vector<450x128xf32> -> vector<450x128xf32>
    %c0_3 = arith.constant 0 : index
    %c0_4 = arith.constant 0 : index
    %3 = vector.load %arg4[%c0_3, %c0_4] : memref<1x128xf32, #tpu.memory_space<vmem>>, vector<1x128xf32>
    %4 = vector.broadcast %3 : vector<1x128xf32> to vector<450x128xf32>
    %5 = arith.addf %2, %4 : vector<450x128xf32>
    %cst_5 = arith.constant 0.000000e+00 : f32
    %6 = vector.broadcast %cst_5 : f32 to vector<450x128xf32>
    %7 = arith.maximumf %5, %6 : vector<450x128xf32>
    %8 = arith.truncf %7 : vector<450x128xf32> to vector<450x128xbf16>
    %c0_6 = arith.constant 0 : index
    %c0_7 = arith.constant 0 : index
    %9 = vector.load %arg5[%c0_6, %c0_7] : memref<450x128xbf16, #tpu.memory_space<vmem>>, vector<450x128xbf16>
    tpu.vector_store %arg5[%c0_6, %c0_7], %8 {strides = array<i32>} : memref<450x128xbf16, #tpu.memory_space<vmem>>, vector<450x128xbf16>,
    return
  }
  func.func @transform_0(%arg0: i32, %arg1: i32) -> (i32, i32) {
    %c0_i32 = arith.constant 0 : i32
    %c0_i32_0 = arith.constant 0 : i32
    return %arg0, %c0_i32 : i32, i32
  }
  func.func @transform_1(%arg0: i32, %arg1: i32) -> (i32, i32) {
    %c0_i32 = arith.constant 0 : i32
    %c0_i32_0 = arith.constant 0 : i32
    return %c0_i32, %arg1 : i32, i32
  }
  func.func @transform_2(%arg0: i32, %arg1: i32) -> (i32, i32) {
    %c0_i32 = arith.constant 0 : i32
    %c0_i32_0 = arith.constant 0 : i32
    return %c0_i32, %arg1 : i32, i32
  }
  func.func @transform_3(%arg0: i32, %arg1: i32) -> (i32, i32) {
    %c0_i32 = arith.constant 0 : i32
    return %arg0, %arg1 : i32, i32
  }
}

</mosaic_0001>

<bundles_post_ra>
// kernel: tpu_custom_call.1
= control target key start
LH: loop header
LB: loop body
LE: loop exit
PB: predicated region body
PF: predicated region fallthrough
CT: control target
= control target key end

     0   :  { %8 = vsyncpa [#allocation3], 0  ;;  %s2938_s0 = inlined_call_operand.hbm [shape: bf16[450,363], index: 0, kind: input, shape index: {}]   ;;  %s2939_s1 = inlined_call_operand.hbm [shape: bf16[363,128], index: 1, kind: input, shape index: {}]   ;;  %s2940_s2 = inlined_call_operand.vmem [shape: f32[1,128], index: 2, kind: input, shape index: {}]   ;;  %s2941_s3 = inlined_call_operand.hbm [shape: bf16[450,128], index: 3, kind: output, shape index: {}]  }
   0x1   :  { %9 = vsyncpa [#allocation6], 0 }
   0x2   :  { %10 = vsyncpa [#allocation4], 0  ;;  %s2684_s12 = smov [#allocation2]   ;;  %s2612_s16 = scalar_lea.hbm %s2938_s0, 10944 }
   0x3   :  { %s16_s13 = sshll.u32 %s2684_s12, 4  ;;  %p2613_p0 = scmp.ne.s32.totalorder %s2938_s0, %s2612_s16  ;;  %s17_s13 = int_to_ptr.vmem [resolvable:$true] %s16_s13 }
   0x4   :  { %p2616_p1 = scmp.lt.u32.totalorder %s2612_s16, %s2938_s0 }
   0x6   :  { %p2618_p2 = pnand %p2616_p1, %p2613_p0 }
   0x8   :  { %2621 = shalt.err (!%p2618_p2)
}
   0x9   :  { %s2622_s21 = scalar_lea.vmem %s17_s13, 10944  ;;  %p2627_p4 = scmp.lt.s32.totalorder %s17_s13, %s17_s13 }
   0xa   :  { %p2623_p3 = scmp.ne.s32.totalorder %s17_s13, %s2622_s21  ;;  %p2628_p5 = scmp.lt.s32.totalorder %s2622_s21, %s2622_s21 }
   0xc   :  { %p2629_p6 = por %p2628_p5, %p2627_p4 }
   0xe   :  { %p2630_p7 = pnand %p2629_p6, %p2623_p3 }
  0x10   :  { %2633 = shalt.err (!%p2630_p7)
}
  0x11   :  { %s2685_s22 = smov 192   ;;  %s2686_s23 = smov 12  }
  0x12   :  { %22 = dma.hbm_to_vmem [thread:$0]  %s2938_s0, 10944, %s17_s13, [#allocation3], %s2685_s22, %s2685_s22, %s2686_s23  }
  0x13   :  { %s2687_s26 = smov [#allocation5]   ;;  %s2634_s30 = scalar_lea.hbm %s2939_s1, 2944 }
  0x14   :  { %s28_s27 = sshll.u32 %s2687_s26, 4  ;;  %p2635_p8 = scmp.ne.s32.totalorder %s2939_s1, %s2634_s30  ;;  %s29_s27 = int_to_ptr.vmem [resolvable:$true] %s28_s27 }
  0x15   :  { %p2638_p9 = scmp.lt.u32.totalorder %s2634_s30, %s2939_s1 }
  0x17   :  { %p2640_p10 = pnand %p2638_p9, %p2635_p8 }
  0x19   :  { %2643 = shalt.err (!%p2640_p10)
}
  0x1a   :  { %s2644_s8 = scalar_lea.vmem %s29_s27, 2944  ;;  %p2649_p12 = scmp.lt.s32.totalorder %s29_s27, %s29_s27 }
  0x1b   :  { %p2645_p11 = scmp.ne.s32.totalorder %s29_s27, %s2644_s8  ;;  %p2650_p13 = scmp.lt.s32.totalorder %s2644_s8, %s2644_s8 }
  0x1d   :  { %p2651_p0 = por %p2650_p13, %p2649_p12 }
  0x1f   :  { %p2652_p1 = pnand %p2651_p0, %p2645_p11 }
  0x21   :  { %2655 = shalt.err (!%p2652_p1)
}
  0x22   :  { %s2688_s0 = smov 64   ;;  %s2689_s9 = smov 4  }
  0x23   :  { %34 = dma.hbm_to_vmem [thread:$0]  %s2939_s1, 2944, %s29_s27, [#allocation6], %s2688_s0, %s2688_s0, %s2689_s9  }
  0x24   :  { %2678 = dma.done.wait [#allocation3], 10944  }
  0x25   :  { %2679 = vsyncadd [#allocation3], 4294956352 }
  0x26   :  { %2680 = dma.done.wait [#allocation6], 2944  }
  0x27   :  { %2681 = vsyncadd [#allocation6], 4294964352  ;;  %v2690_v0 = vmov 0   ;;  %v2691_v1 = vmov 0.0   ;;  %vm2692_vm0 = vmmov 0   ;;  %v2474_v2 = vld [vmem:[#allocation5] sm:$0xff]  }
  0x28   :  { %873 = vmatprep.subr.bf16.mxu1 %v2690_v0  ;;  %2219 = vmatprep.subr.bf16.mxu0 %v2691_v1  ;;  %v2475_v3 = vld [vmem:[#allocation5 + $0x8] sm:$0xff]   ;;  %v2476_v4 = vld [vmem:[#allocation5 + $0x10] sm:$0xff]   ;;  %v2483_v5 = vld [vmem:[#allocation5 + $0x80] sm:$0xff]   ;;  %vm866_vm1 = vcmask 1044480   ;;  %vm867_vm2 = vcmask 1045504   ;;  %v2693_v15 = vmov 65535  }
  0x29   :  { %2233 = vmatprep.mubr.msk.bf16.mxu0 %vm2692_vm0, %v2691_v1  ;;  %874 = vmatpush1.bf16.msra.mxu1 %v2474_v2  ;;  %v2477_v6 = vld [vmem:[#allocation5 + $0x18] sm:$0xff]   ;;  %v2485_v7 = vld [vmem:[#allocation5 + $0x88] sm:$0xff]   ;;  %v2478_v8 = vld [vmem:[#allocation5 + $0x20] sm:$0xff]   ;;  %v868_v16 = vsel %vm866_vm1, 4294967295, %v2693_v15  ;;  %vm778_vm3 = vcmask 875520  }
  0x2a   :  { %875 = vmatprep.subr.bf16.mxu1 %v2690_v0  ;;  %2220 = vmatpush3.bf16.msra.mxu0 %v2483_v5  ;;  %v2487_v9 = vld [vmem:[#allocation5 + $0x90] sm:$0xff]   ;;  %v2479_v10 = vld [vmem:[#allocation5 + $0x28] sm:$0xff]   ;;  %v2489_v11 = vld [vmem:[#allocation5 + $0x98] sm:$0xff]   ;;  %v869_v20 = vsel %vm867_vm2, %v868_v16, 0 }
  0x2b   :  { %2221 = vmatprep.subr.bf16.mxu0 %v2691_v1  ;;  %v2480_v12 = vld [vmem:[#allocation5 + $0x30] sm:$0xff]   ;;  %v2491_v13 = vld [vmem:[#allocation5 + $0xa0] sm:$0xff]   ;;  %v2481_v17 = vld [vmem:[#allocation5 + $0x38] sm:$0xff]  }
  0x2c   :  { %v2499_v14 = vld [vmem:[#allocation2 + $0x4] ss:$12 sps:$4 sm:$0xff]   ;;  %v2493_v18 = vld [vmem:[#allocation5 + $0xa8] sm:$0xff]   ;;  %v2495_v19 = vld [vmem:[#allocation5 + $0xb0] sm:$0x3f]  }
  0x2d   :  { %876 = vmatpush1.bf16.msra.mxu1 %v2475_v3  ;;  %905 = vmatprep.mubr.bf16.mxu1 %v2499_v14  ;;  %v2482_v21 = vld [vmem:[#allocation5 + $0x40] sm:$0xff]   ;;  %v871_v22 = vand.u32 %v2495_v19, %v869_v20  ;;  %v2484_v23 = vld [vmem:[#allocation5 + $0x48] sm:$0xff]   ;;  %v2486_v25 = vld [vmem:[#allocation5 + $0x50] sm:$0xff]  }
  0x2e   :  { %877 = vmatprep.subr.bf16.mxu1 %v2690_v0  ;;  %2222 = vmatpush3.bf16.msra.mxu0 %v2485_v7  ;;  %v2500_v24 = vld [vmem:[#allocation2 + $0x8] ss:$12 sps:$4 sm:$0xff]   ;;  %v2503_v27 = vld [vmem:[#allocation2 + $0x20] ss:$12 sps:$4 sm:$0xff]   ;;  %v2507_v30 = vld [vmem:[#allocation2 + $0x38] ss:$12 sps:$4 sm:$0xff]  }
  0x2f   :  { %2223 = vmatprep.subr.bf16.mxu0 %v2691_v1  ;;  %v2488_v26 = vld [vmem:[#allocation5 + $0x58] sm:$0xff]   ;;  %v2490_v28 = vld [vmem:[#allocation5 + $0x60] sm:$0xff]   ;;  %v2492_v29 = vld [vmem:[#allocation5 + $0x68] sm:$0xff]  }
  0x30   :  { %v2494_v31 = vld [vmem:[#allocation5 + $0x70] sm:$0xff]   ;;  %v2496_v32 = vld [vmem:[#allocation5 + $0x78] sm:$0xff]   ;;  %v2509_v41 = vld [vmem:[#allocation2 + $0x4c] ss:$12 sps:$4 sm:$0xff]  }
  0x31   :  { %878 = vmatpush1.bf16.msra.mxu1 %v2476_v4  ;;  %v2511_v33 = vld [vmem:[#allocation2 + $0x50] ss:$12 sps:$4 sm:$0xff]   ;;  %v2497_v34 = vld [vmem:[#allocation2] ss:$12 sps:$4 sm:$0xff]   ;;  %v2515_v36 = vld [vmem:[#allocation2 + $0x68] ss:$12 sps:$4 sm:$0xff]  }
  0x32   :  { %879 = vmatprep.subr.bf16.mxu1 %v2690_v0  ;;  %2224 = vmatpush3.bf16.msra.mxu0 %v2487_v9  ;;  %v2501_v35 = vld [vmem:[#allocation2 + $0x1c] ss:$12 sps:$4 sm:$0xff]   ;;  %v2504_v37 = vld [vmem:[#allocation2 + $0x18] ss:$12 sps:$4 sm:$0xff]   ;;  %v2505_v38 = vld [vmem:[#allocation2 + $0x34] ss:$12 sps:$4 sm:$0xff]  }
  0x33   :  { %2225 = vmatprep.subr.bf16.mxu0 %v2691_v1  ;;  %v2519_v39 = vld [vmem:[#allocation2 + $0x80] ss:$12 sps:$4 sm:$0xff]   ;;  %v2508_v40 = vld [vmem:[#allocation2 + $0x30] ss:$12 sps:$4 sm:$0xff]   ;;  %v2523_v42 = vld [vmem:[#allocation2 + $0x98] ss:$12 sps:$4 sm:$0xff]  }
  0x34   :  { %v2512_v43 = vld [vmem:[#allocation2 + $0x48] ss:$12 sps:$4 sm:$0xff]   ;;  %v2513_v44 = vld [vmem:[#allocation2 + $0x64] ss:$12 sps:$4 sm:$0xff]   ;;  %v2516_v46 = vld [vmem:[#allocation2 + $0x60] ss:$12 sps:$4 sm:$0xff]  }
  0x35   :  { %880 = vmatpush1.bf16.msra.mxu1 %v2477_v6  ;;  %v2527_v45 = vld [vmem:[#allocation2 + $0xb0] ss:$12 sps:$4 sm:$0xff]   ;;  %v2531_v48 = vld [vmem:[#allocation2 + $0xc8] ss:$12 sps:$4 sm:$0xff]   ;;  %v2520_v49 = vld [vmem:[#allocation2 + $0x78] ss:$12 sps:$4 sm:$0xff]  }
  0x36   :  { %881 = vmatprep.subr.bf16.mxu1 %v2690_v0  ;;  %2226 = vmatpush3.bf16.msra.mxu0 %v2489_v11  ;;  %v2517_v47 = vld [vmem:[#allocation2 + $0x7c] ss:$12 sps:$4 sm:$0xff]   ;;  %v2521_v50 = vld [vmem:[#allocation2 + $0x94] ss:$12 sps:$4 sm:$0xff]   ;;  %v2525_v53 = vld [vmem:[#allocation2 + $0xac] ss:$12 sps:$4 sm:$0xff]  }
  0x37   :  { %2227 = vmatprep.subr.bf16.mxu0 %v2691_v1  ;;  %v2535_v51 = vld [vmem:[#allocation2 + $0xe0] ss:$12 sps:$4 sm:$0xff]   ;;  %v2524_v52 = vld [vmem:[#allocation2 + $0x90] ss:$12 sps:$4 sm:$0xff]   ;;  %v2539_v54 = vld [vmem:[#allocation2 + $0xf8] ss:$12 sps:$4 sm:$0xff]  }
  0x38   :  { %v2528_v55 = vld [vmem:[#allocation2 + $0xa8] ss:$12 sps:$4 sm:$0xff]   ;;  %v2529_v56 = vld [vmem:[#allocation2 + $0xc4] ss:$12 sps:$4 sm:$0xff]   ;;  %v2532_v58 = vld [vmem:[#allocation2 + $0xc0] ss:$12 sps:$4 sm:$0xff]  }
  0x39   :  { %882 = vmatpush1.bf16.msra.mxu1 %v2478_v8  ;;  %v2543_v57 = vld [vmem:[#allocation2 + $0x110] ss:$12 sps:$4 sm:$0xff]   ;;  %v2547_v60 = vld [vmem:[#allocation2 + $0x128] ss:$12 sps:$4 sm:$0xff]   ;;  %v2536_v61 = vld [vmem:[#allocation2 + $0xd8] ss:$12 sps:$4 sm:$0xff]  }
  0x3a   :  { %883 = vmatprep.subr.bf16.mxu1 %v2690_v0  ;;  %2228 = vmatpush3.bf16.msra.mxu0 %v2491_v13  ;;  %v2533_v59 = vld [vmem:[#allocation2 + $0xdc] ss:$12 sps:$4 sm:$0xff]   ;;  %v2537_v62 = vld [vmem:[#allocation2 + $0xf4] ss:$12 sps:$4 sm:$0xff]   ;;  %v2541_v2 = vld [vmem:[#allocation2 + $0x10c] ss:$12 sps:$4 sm:$0xff]  }
  0x3b   :  { %2229 = vmatprep.subr.bf16.mxu0 %v2691_v1  ;;  %v2551_v63 = vld [vmem:[#allocation2 + $0x140] ss:$12 sps:$4 sm:$0xff]   ;;  %v2555_v3 = vld [vmem:[#allocation2 + $0x158] ss:$12 sps:$4 sm:$0xff]   ;;  %v2544_v4 = vld [vmem:[#allocation2 + $0x108] ss:$12 sps:$4 sm:$0xff]  }
  0x3c   :  { %v2545_v5 = vld [vmem:[#allocation2 + $0x124] ss:$12 sps:$4 sm:$0xff]   ;;  %v2548_v7 = vld [vmem:[#allocation2 + $0x120] ss:$12 sps:$4 sm:$0xff]   ;;  %v2549_v8 = vld [vmem:[#allocation2 + $0x13c] ss:$12 sps:$4 sm:$0xff]  }
  0x3d   :  { %884 = vmatpush1.bf16.msra.mxu1 %v2479_v10  ;;  %v2559_v6 = vld [vmem:[#allocation2 + $0x170] ss:$12 sps:$4 sm:$0xff]   ;;  %v2563_v9 = vld [vmem:[#allocation2 + $0x188] ss:$12 sps:$4 sm:$0xff]   ;;  %v2552_v10 = vld [vmem:[#allocation2 + $0x138] ss:$12 sps:$4 sm:$0xff]  }
  0x3e   :  { %885 = vmatprep.subr.bf16.mxu1 %v2690_v0  ;;  %2230 = vmatpush3.bf16.msra.mxu0 %v2493_v18  ;;  %v2553_v11 = vld [vmem:[#allocation2 + $0x154] ss:$12 sps:$4 sm:$0xff]   ;;  %v2556_v13 = vld [vmem:[#allocation2 + $0x150] ss:$12 sps:$4 sm:$0xff]   ;;  %v2557_v14 = vld [vmem:[#allocation2 + $0x16c] ss:$12 sps:$4 sm:$0xff]  }
  0x3f   :  { %2231 = vmatprep.subr.bf16.mxu0 %v2691_v1  ;;  %v2571_v15 = vld [vmem:[#allocation2 + $0x1b8] ss:$12 sps:$4 sm:$0xff]   ;;  %v2560_v16 = vld [vmem:[#allocation2 + $0x168] ss:$12 sps:$4 sm:$0xff]   ;;  %v2575_v18 = vld [vmem:[#allocation2 + $0x1d0] ss:$12 sps:$4 sm:$0xff]  }
  0x40   :  { %v2564_v19 = vld [vmem:[#allocation2 + $0x180] ss:$12 sps:$4 sm:$0xff]   ;;  %v2565_v20 = vld [vmem:[#allocation2 + $0x19c] ss:$12 sps:$4 sm:$0xff]  }
  0x41   :  { %886 = vmatpush1.bf16.msra.mxu1 %v2480_v12  ;;  %v2567_v12 = vld [vmem:[#allocation2 + $0x1a0] ss:$12 sps:$4 sm:$0xff]  }
  0x42   :  { %887 = vmatprep.subr.bf16.mxu1 %v2690_v0  ;;  %2232 = vmatpush3.bf16.msra.mxu0 %v871_v22  ;;  %v2568_v22 = vld [vmem:[#allocation2 + $0x198] ss:$12 sps:$4 sm:$0xff]  }
  0x45   :  { %888 = vmatpush1.bf16.msra.mxu1 %v2481_v17  ;;  %2234 = vmatmul.mubr.msk.bf16.vlgmr.msra.gmra.mrb[0].mxu0 %vm778_vm3, %v2500_v24  ;;  %v2561_v17 = vld [vmem:[#allocation2 + $0x184] ss:$12 sps:$4 sm:$0xff]   ;;  %v2583_v24 = vld [vmem:[#allocation2 + $0x200] ss:$12 sps:$4 sm:$0xff]  }
  0x46   :  { %889 = vmatprep.subr.bf16.mxu1 %v2690_v0  ;;  %2237 = vmatprep.mubr.msk.bf16.mxu0 %vm2692_vm0, %v2691_v1 }
  0x49   :  { %890 = vmatpush1.bf16.msra.mxu1 %v2482_v21  ;;  %v2579_v21 = vld [vmem:[#allocation2 + $0x1e8] ss:$12 sps:$4 sm:$0xff]  }
  0x4a   :  { %891 = vmatprep.subr.bf16.mxu1 %v2690_v0 }
  0x4d   :  { %892 = vmatpush1.bf16.msra.mxu1 %v2484_v23  ;;  %2238 = vmatmul.mubr.msk.bf16.gmra.mrb[4].mxu0 %vm778_vm3, %v2503_v27  ;;  %v2569_v23 = vld [vmem:[#allocation2 + $0x1b4] ss:$12 sps:$4 sm:$0xff]   ;;  %v2587_v27 = vld [vmem:[#allocation2 + $0x218] ss:$12 sps:$4 sm:$0xff]  }
  0x4e   :  { %893 = vmatprep.subr.bf16.mxu1 %v2690_v0  ;;  %2241 = vmatprep.mubr.msk.bf16.mxu0 %vm2692_vm0, %v2691_v1 }
  0x51   :  { %894 = vmatpush1.bf16.msra.mxu1 %v2486_v25  ;;  %v2572_v25 = vld [vmem:[#allocation2 + $0x1b0] ss:$12 sps:$4 sm:$0xff]  }
  0x52   :  { %895 = vmatprep.subr.bf16.mxu1 %v2690_v0 }
  0x55   :  { %896 = vmatpush1.bf16.msra.mxu1 %v2488_v26  ;;  %2242 = vmatmul.mubr.msk.bf16.gmra.mrb[8].mxu0 %vm778_vm3, %v2507_v30  ;;  %v2573_v26 = vld [vmem:[#allocation2 + $0x1cc] ss:$12 sps:$4 sm:$0xff]   ;;  %v2591_v30 = vld [vmem:[#allocation2 + $0x230] ss:$12 sps:$4 sm:$0xff]  }
  0x56   :  { %897 = vmatprep.subr.bf16.mxu1 %v2690_v0  ;;  %2245 = vmatprep.mubr.msk.bf16.mxu0 %vm2692_vm0, %v2691_v1 }
  0x59   :  { %898 = vmatpush1.bf16.msra.mxu1 %v2490_v28  ;;  %v2576_v28 = vld [vmem:[#allocation2 + $0x1c8] ss:$12 sps:$4 sm:$0xff]  }
  0x5a   :  { %899 = vmatprep.subr.bf16.mxu1 %v2690_v0 }
  0x5d   :  { %900 = vmatpush1.bf16.msra.mxu1 %v2492_v29  ;;  %2246 = vmatmul.mubr.msk.bf16.gmra.mrb[12].mxu0 %vm778_vm3, %v2511_v33  ;;  %v2577_v29 = vld [vmem:[#allocation2 + $0x1e4] ss:$12 sps:$4 sm:$0xff]   ;;  %v2595_v33 = vld [vmem:[#allocation2 + $0x248] ss:$12 sps:$4 sm:$0xff]  }
  0x5e   :  { %901 = vmatprep.subr.bf16.mxu1 %v2690_v0  ;;  %2249 = vmatprep.mubr.msk.bf16.mxu0 %vm2692_vm0, %v2691_v1 }
  0x61   :  { %902 = vmatpush1.bf16.msra.mxu1 %v2494_v31  ;;  %v2580_v31 = vld [vmem:[#allocation2 + $0x1e0] ss:$12 sps:$4 sm:$0xff]  }
  0x62   :  { %903 = vmatprep.subr.bf16.mxu1 %v2690_v0  ;;  %v2540_v0 = vld [vmem:[#allocation2 + $0xf0] ss:$12 sps:$4 sm:$0xff]  }
  0x65   :  { %904 = vmatpush1.bf16.msra.mxu1 %v2496_v32  ;;  %2250 = vmatmul.mubr.msk.bf16.gmra.mrb[16].mxu0 %vm778_vm3, %v2515_v36  ;;  %v2581_v32 = vld [vmem:[#allocation2 + $0x1fc] ss:$12 sps:$4 sm:$0xff]   ;;  %v2599_v36 = vld [vmem:[#allocation2 + $0x260] ss:$12 sps:$4 sm:$0xff]  }
  0x66   :  { %2253 = vmatprep.mubr.msk.bf16.mxu0 %vm2692_vm0, %v2691_v1 }
  0x68   :  { %906 = vmatmul.mubr.bf16.vlgmr.msra.gmra.mrb[0].mxu1 %v2497_v34  ;;  %v2584_v34 = vld [vmem:[#allocation2 + $0x1f8] ss:$12 sps:$4 sm:$0xff]  }
  0x69   :  { %913 = vmatprep.mubr.bf16.mxu1 %v2501_v35  ;;  %v2585_v35 = vld [vmem:[#allocation2 + $0x214] ss:$12 sps:$4 sm:$0xff]  }
  0x6d   :  { %2254 = vmatmul.mubr.msk.bf16.gmra.mrb[20].mxu0 %vm778_vm3, %v2519_v39  ;;  %v2603_v39 = vld [vmem:[#allocation2 + $0x278] ss:$12 sps:$4 sm:$0xff]  }
  0x6e   :  { %2257 = vmatprep.mubr.msk.bf16.mxu0 %vm2692_vm0, %v2691_v1 }
  0x70   :  { %914 = vmatmul.mubr.bf16.gmra.mrb[4].mxu1 %v2504_v37  ;;  %v2588_v37 = vld [vmem:[#allocation2 + $0x210] ss:$12 sps:$4 sm:$0xff]  }
  0x71   :  { %921 = vmatprep.mubr.bf16.mxu1 %v2505_v38  ;;  %v2589_v38 = vld [vmem:[#allocation2 + $0x22c] ss:$12 sps:$4 sm:$0xff]  }
  0x75   :  { %2258 = vmatmul.mubr.msk.bf16.gmra.mrb[24].mxu0 %vm778_vm3, %v2523_v42 }
  0x76   :  { %2261 = vmatprep.mubr.msk.bf16.mxu0 %vm2692_vm0, %v2691_v1 }
  0x78   :  { %922 = vmatmul.mubr.bf16.gmra.mrb[8].mxu1 %v2508_v40  ;;  %v2592_v40 = vld [vmem:[#allocation2 + $0x228] ss:$12 sps:$4 sm:$0xff]  }
  0x79   :  { %929 = vmatprep.mubr.bf16.mxu1 %v2509_v41  ;;  %v2593_v41 = vld [vmem:[#allocation2 + $0x244] ss:$12 sps:$4 sm:$0xff]  }
  0x7d   :  { %2262 = vmatmul.mubr.msk.bf16.gmra.mrb[28].mxu0 %vm778_vm3, %v2527_v45 }
  0x7e   :  { %2265 = vmatprep.mubr.msk.bf16.mxu0 %vm2692_vm0, %v2691_v1 }
  0x80   :  { %930 = vmatmul.mubr.bf16.gmra.mrb[12].mxu1 %v2512_v43 }
  0x81   :  { %937 = vmatprep.mubr.bf16.mxu1 %v2513_v44  ;;  %v2607_v44 = vld [vmem:[#allocation2 + $0x290] ss:$12 sps:$4 sm:$0xff]  }
  0x85   :  { %2266 = vmatmul.mubr.msk.bf16.gmra.mrb[32].mxu0 %vm778_vm3, %v2531_v48  ;;  %v2597_v48 = vld [vmem:[#allocation2 + $0x25c] ss:$12 sps:$4 sm:$0xff]  }
  0x86   :  { %2269 = vmatprep.mubr.msk.bf16.mxu0 %vm2692_vm0, %v2691_v1 }
  0x88   :  { %938 = vmatmul.mubr.bf16.gmra.mrb[16].mxu1 %v2516_v46 }
  0x89   :  { %945 = vmatprep.mubr.bf16.mxu1 %v2517_v47  ;;  %v2596_v47 = vld [vmem:[#allocation2 + $0x240] ss:$12 sps:$4 sm:$0xff]  }
  0x8d   :  { %2270 = vmatmul.mubr.msk.bf16.gmra.mrb[36].mxu0 %vm778_vm3, %v2535_v51  ;;  %v2610_v51 = vld [vmem:[#allocation2 + $0x2a8] ss:$0 sps:$4 sm:$0x11]  }
  0x8e   :  { %2273 = vmatprep.mubr.msk.bf16.mxu0 %vm2692_vm0, %v2691_v1 }
  0x90   :  { %946 = vmatmul.mubr.bf16.gmra.mrb[20].mxu1 %v2520_v49 }
  0x91   :  { %953 = vmatprep.mubr.bf16.mxu1 %v2521_v50 }
  0x95   :  { %2274 = vmatmul.mubr.msk.bf16.gmra.mrb[40].mxu0 %vm778_vm3, %v2539_v54  ;;  %v2600_v54 = vld [vmem:[#allocation2 + $0x258] ss:$12 sps:$4 sm:$0xff]  }
  0x96   :  { %2277 = vmatprep.mubr.msk.bf16.mxu0 %vm2692_vm0, %v2691_v1 }
  0x98   :  { %954 = vmatmul.mubr.bf16.gmra.mrb[24].mxu1 %v2524_v52 }
  0x99   :  { %961 = vmatprep.mubr.bf16.mxu1 %v2525_v53 }
  0x9d   :  { %2278 = vmatmul.mubr.msk.bf16.gmra.mrb[44].mxu0 %vm778_vm3, %v2543_v57 }
  0x9e   :  { %2281 = vmatprep.mubr.msk.bf16.mxu0 %vm2692_vm0, %v2691_v1 }
  0xa0   :  { %962 = vmatmul.mubr.bf16.gmra.mrb[28].mxu1 %v2528_v55  ;;  %v2601_v55 = vld [vmem:[#allocation2 + $0x274] ss:$12 sps:$4 sm:$0xff]  }
  0xa1   :  { %969 = vmatprep.mubr.bf16.mxu1 %v2529_v56 }
  0xa5   :  { %2282 = vmatmul.mubr.msk.bf16.gmra.mrb[48].mxu0 %vm778_vm3, %v2547_v60  ;;  %v2604_v60 = vld [vmem:[#allocation2 + $0x270] ss:$12 sps:$4 sm:$0xff]  }
  0xa6   :  { %2285 = vmatprep.mubr.msk.bf16.mxu0 %vm2692_vm0, %v2691_v1 }
  0xa8   :  { %970 = vmatmul.mubr.bf16.gmra.mrb[32].mxu1 %v2532_v58 }
  0xa9   :  { %977 = vmatprep.mubr.bf16.mxu1 %v2533_v59 }
  0xad   :  { %2286 = vmatmul.mubr.msk.bf16.gmra.mrb[52].mxu0 %vm778_vm3, %v2551_v63 }
  0xae   :  { %2289 = vmatprep.mubr.msk.bf16.mxu0 %vm2692_vm0, %v2691_v1 }
  0xb0   :  { %978 = vmatmul.mubr.bf16.gmra.mrb[36].mxu1 %v2536_v61  ;;  %v2605_v61 = vld [vmem:[#allocation2 + $0x28c] ss:$12 sps:$4 sm:$0xff]  }
  0xb1   :  { %985 = vmatprep.mubr.bf16.mxu1 %v2537_v62  ;;  %v2857_v62 = vld [vmem:[%s2940_s2] ss:$0 sm:$0xff]  ;;  %s2694_s2 = smov [#allocation7]  }
  0xb2   :  { %s1749_s13 = sshll.u32 %s2694_s2, 4  ;;  %s1750_s13 = int_to_ptr.vmem [resolvable:$true] %s1749_s13 }
  0xb3   :  { %s2656_s14 = scalar_lea.vmem %s1750_s13, 3648  ;;  %p2661_p3 = scmp.lt.s32.totalorder %s1750_s13, %s1750_s13 }
  0xb4   :  { %p2657_p2 = scmp.ne.s32.totalorder %s1750_s13, %s2656_s14  ;;  %p2662_p4 = scmp.lt.s32.totalorder %s2656_s14, %s2656_s14 }
  0xb5   :  { %2290 = vmatmul.mubr.msk.bf16.gmra.mrb[56].mxu0 %vm778_vm3, %v2555_v3 }
  0xb6   :  { %2293 = vmatprep.mubr.msk.bf16.mxu0 %vm2692_vm0, %v2691_v1  ;;  %p2663_p5 = por %p2662_p4, %p2661_p3 }
  0xb8   :  { %986 = vmatmul.mubr.bf16.gmra.mrb[40].mxu1 %v2540_v0  ;;  %v156_v0 = vld [vmem:[#allocation2 + $0x2a0] sm:$0x11]  ;;  %p2664_p6 = pnand %p2663_p5, %p2657_p2 }
  0xb9   :  { %993 = vmatprep.mubr.bf16.mxu1 %v2541_v2 }
  0xbd   :  { %2294 = vmatmul.mubr.msk.bf16.gmra.mrb[60].mxu0 %vm778_vm3, %v2559_v6 }
  0xbe   :  { %2297 = vmatprep.mubr.msk.bf16.mxu0 %vm2692_vm0, %v2691_v1 }
  0xc0   :  { %994 = vmatmul.mubr.bf16.gmra.mrb[44].mxu1 %v2544_v4 }
  0xc1   :  { %1001 = vmatprep.mubr.bf16.mxu1 %v2545_v5 }
  0xc5   :  { %2298 = vmatmul.mubr.msk.bf16.gmra.mrb[64].mxu0 %vm778_vm3, %v2563_v9  ;;  %v1848_v9 = vcombine.high %v156_v0, %v156_v0 }
  0xc6   :  { %2301 = vmatprep.mubr.msk.bf16.mxu0 %vm2692_vm0, %v2691_v1 }
  0xc8   :  { %1002 = vmatmul.mubr.bf16.gmra.mrb[48].mxu1 %v2548_v7  ;;  %v2608_v7 = vld [vmem:[#allocation2 + $0x288] ss:$12 sps:$4 sm:$0xff]  }
  0xc9   :  { %1009 = vmatprep.mubr.bf16.mxu1 %v2549_v8 }
  0xcd   :  { %2302 = vmatmul.mubr.msk.bf16.gmra.mrb[68].mxu0 %vm778_vm3, %v2567_v12 }
  0xce   :  { %2305 = vmatprep.mubr.msk.bf16.mxu0 %vm2692_vm0, %v2691_v1 }
  0xd0   :  { %1010 = vmatmul.mubr.bf16.gmra.mrb[52].mxu1 %v2552_v10 }
  0xd1   :  { %1017 = vmatprep.mubr.bf16.mxu1 %v2553_v11 }
  0xd5   :  { %2306 = vmatmul.mubr.msk.bf16.gmra.mrb[72].mxu0 %vm778_vm3, %v2571_v15 }
  0xd6   :  { %2309 = vmatprep.mubr.msk.bf16.mxu0 %vm2692_vm0, %v2691_v1 }
  0xd8   :  { %1018 = vmatmul.mubr.bf16.gmra.mrb[56].mxu1 %v2556_v13 }
  0xd9   :  { %1025 = vmatprep.mubr.bf16.mxu1 %v2557_v14 }
  0xdd   :  { %2310 = vmatmul.mubr.msk.bf16.gmra.mrb[76].mxu0 %vm778_vm3, %v2575_v18 }
  0xde   :  { %2313 = vmatprep.mubr.msk.bf16.mxu0 %vm2692_vm0, %v2691_v1 }
  0xe0   :  { %1026 = vmatmul.mubr.bf16.gmra.mrb[60].mxu1 %v2560_v16 }
  0xe1   :  { %1033 = vmatprep.mubr.bf16.mxu1 %v2561_v17 }
  0xe5   :  { %2314 = vmatmul.mubr.msk.bf16.gmra.mrb[80].mxu0 %vm778_vm3, %v2579_v21 }
  0xe6   :  { %2317 = vmatprep.mubr.msk.bf16.mxu0 %vm2692_vm0, %v2691_v1 }
  0xe8   :  { %1034 = vmatmul.mubr.bf16.gmra.mrb[64].mxu1 %v2564_v19 }
  0xe9   :  { %1041 = vmatprep.mubr.bf16.mxu1 %v2565_v20 }
  0xed   :  { %2318 = vmatmul.mubr.msk.bf16.gmra.mrb[84].mxu0 %vm778_vm3, %v2583_v24  ;;  %v1847_v24 = vcombine.low %v156_v0, %v156_v0 }
  0xee   :  { %2321 = vmatprep.mubr.msk.bf16.mxu0 %vm2692_vm0, %v2691_v1 }
  0xf0   :  { %1042 = vmatmul.mubr.bf16.gmra.mrb[68].mxu1 %v2568_v22 }
  0xf1   :  { %1049 = vmatprep.mubr.bf16.mxu1 %v2569_v23 }
  0xf5   :  { %2322 = vmatmul.mubr.msk.bf16.gmra.mrb[88].mxu0 %vm778_vm3, %v2587_v27 }
  0xf6   :  { %2325 = vmatprep.mubr.msk.bf16.mxu0 %vm2692_vm0, %v2691_v1 }
  0xf8   :  { %1050 = vmatmul.mubr.bf16.gmra.mrb[72].mxu1 %v2572_v25 }
  0xf9   :  { %1057 = vmatprep.mubr.bf16.mxu1 %v2573_v26 }
  0xfd   :  { %2326 = vmatmul.mubr.msk.bf16.gmra.mrb[92].mxu0 %vm778_vm3, %v2591_v30 }
  0xfe   :  { %2329 = vmatprep.mubr.msk.bf16.mxu0 %vm2692_vm0, %v2691_v1 }
 0x100   :  { %1058 = vmatmul.mubr.bf16.gmra.mrb[76].mxu1 %v2576_v28 }
 0x101   :  { %1065 = vmatprep.mubr.bf16.mxu1 %v2577_v29 }
 0x105   :  { %2330 = vmatmul.mubr.msk.bf16.gmra.mrb[96].mxu0 %vm778_vm3, %v2595_v33 }
 0x106   :  { %2333 = vmatprep.mubr.msk.bf16.mxu0 %vm2692_vm0, %v2691_v1 }
 0x108   :  { %1066 = vmatmul.mubr.bf16.gmra.mrb[80].mxu1 %v2580_v31 }
 0x109   :  { %1073 = vmatprep.mubr.bf16.mxu1 %v2581_v32 }
 0x10d   :  { %2334 = vmatmul.mubr.msk.bf16.gmra.mrb[100].mxu0 %vm778_vm3, %v2599_v36 }
 0x10e   :  { %2337 = vmatprep.mubr.msk.bf16.mxu0 %vm2692_vm0, %v2691_v1 }
 0x110   :  { %1074 = vmatmul.mubr.bf16.gmra.mrb[84].mxu1 %v2584_v34 }
 0x111   :  { %1081 = vmatprep.mubr.bf16.mxu1 %v2585_v35 }
 0x115   :  { %2338 = vmatmul.mubr.msk.bf16.gmra.mrb[104].mxu0 %vm778_vm3, %v2603_v39 }
 0x116   :  { %2341 = vmatprep.mubr.msk.bf16.mxu0 %vm2692_vm0, %v2691_v1 }
 0x118   :  { %1082 = vmatmul.mubr.bf16.gmra.mrb[88].mxu1 %v2588_v37  ;;  %v1171_v42 = vpop.f32.mrb[0].mxu0 }
 0x119   :  { %1089 = vmatprep.mubr.bf16.mxu1 %v2589_v38  ;;  %v2235_v43 = vpop.f32.mrb[1].mxu0 }
 0x11a   :  { %v1174_v45 = vpop.f32.mrb[2].mxu0 }
 0x11b   :  { %v2236_v46 = vpop.f32.mrb[3].mxu0 }
 0x11d   :  { %2342 = vmatmul.mubr.msk.bf16.gmra.mrb[108].mxu0 %vm778_vm3, %v2607_v44 }
 0x11e   :  { %2345 = vmatprep.mubr.msk.bf16.mxu0 %vm2692_vm0, %v2691_v1 }
 0x120   :  { %1090 = vmatmul.mubr.bf16.gmra.mrb[92].mxu1 %v2592_v40  ;;  %v1179_v49 = vpop.f32.mrb[4].mxu0 }
 0x121   :  { %1097 = vmatprep.mubr.bf16.mxu1 %v2593_v41  ;;  %v2239_v50 = vpop.f32.mrb[5].mxu0 }
 0x122   :  { %v1182_v52 = vpop.f32.mrb[6].mxu0 }
 0x123   :  { %v2240_v53 = vpop.f32.mrb[7].mxu0 }
 0x125   :  { %2346 = vmatmul.mubr.msk.bf16.gmra.mrb[112].mxu0 %vm778_vm3, %v2610_v51 }
 0x128   :  { %1098 = vmatmul.mubr.bf16.gmra.mrb[96].mxu1 %v2596_v47  ;;  %v1187_v56 = vpop.f32.mrb[8].mxu0 }
 0x129   :  { %1105 = vmatprep.mubr.bf16.mxu1 %v2597_v48  ;;  %v2243_v57 = vpop.f32.mrb[9].mxu0 }
 0x12a   :  { %v1190_v58 = vpop.f32.mrb[10].mxu0 }
 0x12b   :  { %v2244_v59 = vpop.f32.mrb[11].mxu0 }
 0x130   :  { %1106 = vmatmul.mubr.bf16.gmra.mrb[100].mxu1 %v2600_v54  ;;  %v2852_v1 = vpop.f32.mrb[12].mxu0 }
 0x131   :  { %1113 = vmatprep.mubr.bf16.mxu1 %v2601_v55  ;;  %v2247_v63 = vpop.f32.mrb[13].mxu0 }
 0x132   :  { %v2859_v2 = vpop.f32.mrb[14].mxu0 }
 0x133   :  { %v2248_v4 = vpop.f32.mrb[15].mxu0 }
 0x138   :  { %1114 = vmatmul.mubr.bf16.gmra.mrb[104].mxu1 %v2604_v60  ;;  %v2863_v14 = vpop.f32.mrb[16].mxu0 }
 0x139   :  { %1121 = vmatprep.mubr.bf16.mxu1 %v2605_v61  ;;  %v2251_v15 = vpop.f32.mrb[17].mxu0 }
 0x13a   :  { %v1206_v18 = vpop.f32.mrb[18].mxu0 }
 0x13b   :  { %v907_v3 = vpop.f32.mrb[0].mxu1  ;;  %v2252_v20 = vpop.f32.mrb[19].mxu0 }
 0x13c   :  { %v908_v5 = vadd.f32 %v2857_v62, %v907_v3  ;;  %v909_v6 = vpop.f32.mrb[1].mxu1 }
 0x13d   :  { %v910_v8 = vpop.f32.mrb[2].mxu1 }
 0x13e   :  { %v1172_v10 = vadd.f32 %v1171_v42, %v908_v5  ;;  %v911_v11 = vadd.f32 %v2857_v62, %v910_v8  ;;  %v912_v12 = vpop.f32.mrb[3].mxu1 }
 0x140   :  { %v1175_v13 = vadd.f32 %v1174_v45, %v911_v11  ;;  %1122 = vmatmul.mubr.bf16.gmra.mrb[108].mxu1 %v2608_v7  ;;  %v1401_v16 = vmax.f32 %v1172_v10, 0.0  ;;  %v1211_v30 = vpop.f32.mrb[20].mxu0 }
 0x141   :  { %1129 = vmatprep.mubr.bf16.mxu1 %v1848_v9  ;;  %v2255_v31 = vpop.f32.mrb[21].mxu0 }
 0x142   :  { %v1402_v17 = vmax.f32 %v1175_v13, 0.0  ;;  %v1214_v34 = vpop.f32.mrb[22].mxu0 }
 0x143   :  { %v915_v19 = vpop.f32.mrb[4].mxu1  ;;  %v2256_v36 = vpop.f32.mrb[23].mxu0 }
 0x144   :  { %v2019_v21 = vpack.c.bf16 %v1402_v17, %v1401_v16  ;;  %v916_v22 = vadd.f32 %v2857_v62, %v915_v19  ;;  %v917_v23 = vpop.f32.mrb[5].mxu1 }
 0x145   :  { %v918_v25 = vpop.f32.mrb[6].mxu1 }
 0x146   :  { %2020 = vst [vmem:[#allocation7] sm:$0xff] %v2019_v21   ;;  %v1180_v26 = vadd.f32 %v1179_v49, %v916_v22  ;;  %v919_v27 = vadd.f32 %v2857_v62, %v918_v25  ;;  %v920_v28 = vpop.f32.mrb[7].mxu1 }
 0x148   :  { %v1183_v29 = vadd.f32 %v1182_v52, %v919_v27  ;;  %1130 = vmatmul.mubr.bf16.gmra.mrb[112].mxu1 %v1847_v24  ;;  %v1403_v32 = vmax.f32 %v1180_v26, 0.0  ;;  %v1219_v45 = vpop.f32.mrb[24].mxu0 }
 0x149   :  { %v2259_v46 = vpop.f32.mrb[25].mxu0 }
 0x14a   :  { %v1404_v33 = vmax.f32 %v1183_v29, 0.0  ;;  %v1222_v49 = vpop.f32.mrb[26].mxu0 }
 0x14b   :  { %v923_v35 = vpop.f32.mrb[8].mxu1  ;;  %v2260_v51 = vpop.f32.mrb[27].mxu0 }
 0x14c   :  { %v2024_v37 = vpack.c.bf16 %v1404_v33, %v1403_v32  ;;  %v924_v38 = vadd.f32 %v2857_v62, %v923_v35  ;;  %v925_v39 = vpop.f32.mrb[9].mxu1 }
 0x14d   :  { %v926_v40 = vpop.f32.mrb[10].mxu1 }
 0x14e   :  { %2156 = vst [vmem:[#allocation7 + $0x8] sm:$0xff] %v2024_v37   ;;  %v1188_v41 = vadd.f32 %v1187_v56, %v924_v38  ;;  %v927_v42 = vadd.f32 %v2857_v62, %v926_v40  ;;  %v928_v43 = vpop.f32.mrb[11].mxu1 }
 0x150   :  { %v1191_v44 = vadd.f32 %v1190_v58, %v927_v42  ;;  %v1405_v47 = vmax.f32 %v1188_v41, 0.0  ;;  %v1227_v60 = vpop.f32.mrb[28].mxu0 }
 0x151   :  { %v2263_v61 = vpop.f32.mrb[29].mxu0 }
 0x152   :  { %v1406_v48 = vmax.f32 %v1191_v44, 0.0  ;;  %v1230_v3 = vpop.f32.mrb[30].mxu0 }
 0x153   :  { %v931_v50 = vpop.f32.mrb[12].mxu1  ;;  %v2264_v5 = vpop.f32.mrb[31].mxu0 }
 0x154   :  { %v2029_v52 = vpack.c.bf16 %v1406_v48, %v1405_v47  ;;  %v932_v53 = vadd.f32 %v2857_v62, %v931_v50  ;;  %v933_v54 = vpop.f32.mrb[13].mxu1 }
 0x155   :  { %v934_v55 = vpop.f32.mrb[14].mxu1 }
 0x156   :  { %2157 = vst [vmem:[#allocation7 + $0x10] sm:$0xff] %v2029_v52   ;;  %v1196_v57 = vadd.f32 %v2852_v1, %v932_v53  ;;  %v935_v56 = vadd.f32 %v2857_v62, %v934_v55  ;;  %v936_v59 = vpop.f32.mrb[15].mxu1 }
 0x158   :  { %v1199_v58 = vadd.f32 %v2859_v2, %v935_v56  ;;  %v1407_v63 = vmax.f32 %v1196_v57, 0.0  ;;  %v1235_v2 = vpop.f32.mrb[32].mxu0 }
 0x159   :  { %v2267_v13 = vpop.f32.mrb[33].mxu0 }
 0x15a   :  { %v1408_v0 = vmax.f32 %v1199_v58, 0.0  ;;  %v1238_v17 = vpop.f32.mrb[34].mxu0 }
 0x15b   :  { %v939_v4 = vpop.f32.mrb[16].mxu1  ;;  %v2268_v20 = vpop.f32.mrb[35].mxu0 }
 0x15c   :  { %v2034_v6 = vpack.c.bf16 %v1408_v0, %v1407_v63  ;;  %v940_v7 = vadd.f32 %v2857_v62, %v939_v4  ;;  %v941_v8 = vpop.f32.mrb[17].mxu1 }
 0x15d   :  { %v942_v9 = vpop.f32.mrb[18].mxu1 }
 0x15e   :  { %2158 = vst [vmem:[#allocation7 + $0x18] sm:$0xff] %v2034_v6   ;;  %v1204_v1 = vadd.f32 %v2863_v14, %v940_v7  ;;  %v943_v10 = vadd.f32 %v2857_v62, %v942_v9  ;;  %v944_v11 = vpop.f32.mrb[19].mxu1 }
 0x160   :  { %v1207_v12 = vadd.f32 %v1206_v18, %v943_v10  ;;  %v1409_v15 = vmax.f32 %v1204_v1, 0.0  ;;  %v1243_v28 = vpop.f32.mrb[36].mxu0 }
 0x161   :  { %v2271_v18 = vpop.f32.mrb[37].mxu0 }
 0x162   :  { %v1410_v16 = vmax.f32 %v1207_v12, 0.0  ;;  %v1246_v32 = vpop.f32.mrb[38].mxu0 }
 0x163   :  { %v947_v19 = vpop.f32.mrb[20].mxu1  ;;  %v2272_v35 = vpop.f32.mrb[39].mxu0 }
 0x164   :  { %v2039_v21 = vpack.c.bf16 %v1410_v16, %v1409_v15  ;;  %v948_v22 = vadd.f32 %v2857_v62, %v947_v19  ;;  %v949_v23 = vpop.f32.mrb[21].mxu1 }
 0x165   :  { %v950_v24 = vpop.f32.mrb[22].mxu1 }
 0x166   :  { %2159 = vst [vmem:[#allocation7 + $0x20] sm:$0xff] %v2039_v21   ;;  %v1212_v25 = vadd.f32 %v1211_v30, %v948_v22  ;;  %v951_v14 = vadd.f32 %v2857_v62, %v950_v24  ;;  %v952_v26 = vpop.f32.mrb[23].mxu1 }
 0x168   :  { %v1215_v27 = vadd.f32 %v1214_v34, %v951_v14  ;;  %v1411_v29 = vmax.f32 %v1212_v25, 0.0  ;;  %v1251_v43 = vpop.f32.mrb[40].mxu0 }
 0x169   :  { %v2275_v34 = vpop.f32.mrb[41].mxu0 }
 0x16a   :  { %v1412_v31 = vmax.f32 %v1215_v27, 0.0  ;;  %v1254_v47 = vpop.f32.mrb[42].mxu0 }
 0x16b   :  { %v955_v33 = vpop.f32.mrb[24].mxu1  ;;  %v2276_v50 = vpop.f32.mrb[43].mxu0 }
 0x16c   :  { %v2044_v36 = vpack.c.bf16 %v1412_v31, %v1411_v29  ;;  %v956_v37 = vadd.f32 %v2857_v62, %v955_v33  ;;  %v957_v38 = vpop.f32.mrb[25].mxu1 }
 0x16d   :  { %v958_v39 = vpop.f32.mrb[26].mxu1 }
 0x16e   :  { %2160 = vst [vmem:[#allocation7 + $0x28] sm:$0xff] %v2044_v36   ;;  %v1220_v40 = vadd.f32 %v1219_v45, %v956_v37  ;;  %v959_v30 = vadd.f32 %v2857_v62, %v958_v39  ;;  %v960_v41 = vpop.f32.mrb[27].mxu1 }
 0x170   :  { %v1223_v42 = vadd.f32 %v1222_v49, %v959_v30  ;;  %v1413_v44 = vmax.f32 %v1220_v40, 0.0  ;;  %v1259_v59 = vpop.f32.mrb[44].mxu0 }
 0x171   :  { %v2279_v49 = vpop.f32.mrb[45].mxu0 }
 0x172   :  { %v1414_v46 = vmax.f32 %v1223_v42, 0.0  ;;  %v1262_v63 = vpop.f32.mrb[46].mxu0 }
 0x173   :  { %v963_v48 = vpop.f32.mrb[28].mxu1  ;;  %v2280_v4 = vpop.f32.mrb[47].mxu0 }
 0x174   :  { %v2049_v51 = vpack.c.bf16 %v1414_v46, %v1413_v44  ;;  %v964_v52 = vadd.f32 %v2857_v62, %v963_v48  ;;  %v965_v53 = vpop.f32.mrb[29].mxu1 }
 0x175   :  { %v966_v54 = vpop.f32.mrb[30].mxu1 }
 0x176   :  { %2161 = vst [vmem:[#allocation7 + $0x30] sm:$0xff] %v2049_v51   ;;  %v1228_v55 = vadd.f32 %v1227_v60, %v964_v52  ;;  %v967_v45 = vadd.f32 %v2857_v62, %v966_v54  ;;  %v968_v57 = vpop.f32.mrb[31].mxu1 }
 0x178   :  { %v1231_v56 = vadd.f32 %v1230_v3, %v967_v45  ;;  %v1415_v58 = vmax.f32 %v1228_v55, 0.0  ;;  %v1267_v11 = vpop.f32.mrb[48].mxu0 }
 0x179   :  { %v2283_v3 = vpop.f32.mrb[49].mxu0 }
 0x17a   :  { %v1416_v61 = vmax.f32 %v1231_v56, 0.0  ;;  %v1270_v15 = vpop.f32.mrb[50].mxu0 }
 0x17b   :  { %v971_v0 = vpop.f32.mrb[32].mxu1  ;;  %v2284_v19 = vpop.f32.mrb[51].mxu0 }
 0x17c   :  { %v2054_v5 = vpack.c.bf16 %v1416_v61, %v1415_v58  ;;  %v972_v6 = vadd.f32 %v2857_v62, %v971_v0  ;;  %v973_v7 = vpop.f32.mrb[33].mxu1 }
 0x17d   :  { %v974_v8 = vpop.f32.mrb[34].mxu1 }
 0x17e   :  { %2162 = vst [vmem:[#allocation7 + $0x38] sm:$0xff] %v2054_v5   ;;  %v1236_v9 = vadd.f32 %v1235_v2, %v972_v6  ;;  %v975_v60 = vadd.f32 %v2857_v62, %v974_v8  ;;  %v976_v1 = vpop.f32.mrb[35].mxu1 }
 0x180   :  { %v1239_v10 = vadd.f32 %v1238_v17, %v975_v60  ;;  %v1417_v12 = vmax.f32 %v1236_v9, 0.0  ;;  %v1275_v26 = vpop.f32.mrb[52].mxu0 }
 0x181   :  { %v2287_v17 = vpop.f32.mrb[53].mxu0 }
 0x182   :  { %v1418_v13 = vmax.f32 %v1239_v10, 0.0  ;;  %v1278_v29 = vpop.f32.mrb[54].mxu0 }
 0x183   :  { %v979_v16 = vpop.f32.mrb[36].mxu1  ;;  %v2288_v33 = vpop.f32.mrb[55].mxu0 }
 0x184   :  { %v2059_v20 = vpack.c.bf16 %v1418_v13, %v1417_v12  ;;  %v980_v21 = vadd.f32 %v2857_v62, %v979_v16  ;;  %v981_v22 = vpop.f32.mrb[37].mxu1 }
 0x185   :  { %v982_v23 = vpop.f32.mrb[38].mxu1 }
 0x186   :  { %2163 = vst [vmem:[#allocation7 + $0x40] sm:$0xff] %v2059_v20   ;;  %v1244_v24 = vadd.f32 %v1243_v28, %v980_v21  ;;  %v983_v2 = vadd.f32 %v2857_v62, %v982_v23  ;;  %v984_v25 = vpop.f32.mrb[39].mxu1 }
 0x188   :  { %v1247_v14 = vadd.f32 %v1246_v32, %v983_v2  ;;  %v1419_v27 = vmax.f32 %v1244_v24, 0.0  ;;  %v1283_v41 = vpop.f32.mrb[56].mxu0 }
 0x189   :  { %v2291_v32 = vpop.f32.mrb[57].mxu0 }
 0x18a   :  { %v1420_v18 = vmax.f32 %v1247_v14, 0.0  ;;  %v1286_v44 = vpop.f32.mrb[58].mxu0 }
 0x18b   :  { %v987_v31 = vpop.f32.mrb[40].mxu1  ;;  %v2292_v48 = vpop.f32.mrb[59].mxu0 }
 0x18c   :  { %v2064_v35 = vpack.c.bf16 %v1420_v18, %v1419_v27  ;;  %v988_v36 = vadd.f32 %v2857_v62, %v987_v31  ;;  %v989_v37 = vpop.f32.mrb[41].mxu1 }
 0x18d   :  { %v990_v38 = vpop.f32.mrb[42].mxu1 }
 0x18e   :  { %2164 = vst [vmem:[#allocation7 + $0x48] sm:$0xff] %v2064_v35   ;;  %v1252_v39 = vadd.f32 %v1251_v43, %v988_v36  ;;  %v991_v28 = vadd.f32 %v2857_v62, %v990_v38  ;;  %v992_v40 = vpop.f32.mrb[43].mxu1 }
 0x190   :  { %v1255_v30 = vadd.f32 %v1254_v47, %v991_v28  ;;  %v1421_v42 = vmax.f32 %v1252_v39, 0.0  ;;  %v1291_v57 = vpop.f32.mrb[60].mxu0 }
 0x191   :  { %v2295_v47 = vpop.f32.mrb[61].mxu0 }
 0x192   :  { %v1422_v34 = vmax.f32 %v1255_v30, 0.0  ;;  %v1294_v58 = vpop.f32.mrb[62].mxu0 }
 0x193   :  { %v995_v46 = vpop.f32.mrb[44].mxu1  ;;  %v2296_v0 = vpop.f32.mrb[63].mxu0 }
 0x194   :  { %v2069_v50 = vpack.c.bf16 %v1422_v34, %v1421_v42  ;;  %v996_v51 = vadd.f32 %v2857_v62, %v995_v46  ;;  %v997_v52 = vpop.f32.mrb[45].mxu1 }
 0x195   :  { %v998_v53 = vpop.f32.mrb[46].mxu1 }
 0x196   :  { %2165 = vst [vmem:[#allocation7 + $0x50] sm:$0xff] %v2069_v50   ;;  %v1260_v54 = vadd.f32 %v1259_v59, %v996_v51  ;;  %v999_v43 = vadd.f32 %v2857_v62, %v998_v53  ;;  %v1000_v55 = vpop.f32.mrb[47].mxu1 }
 0x198   :  { %v1263_v45 = vadd.f32 %v1262_v63, %v999_v43  ;;  %v1423_v56 = vmax.f32 %v1260_v54, 0.0  ;;  %v1299_v1 = vpop.f32.mrb[64].mxu0 }
 0x199   :  { %v2299_v63 = vpop.f32.mrb[65].mxu0 }
 0x19a   :  { %v1424_v49 = vmax.f32 %v1263_v45, 0.0  ;;  %v1302_v12 = vpop.f32.mrb[66].mxu0 }
 0x19b   :  { %v1003_v61 = vpop.f32.mrb[48].mxu1  ;;  %v2300_v16 = vpop.f32.mrb[67].mxu0 }
 0x19c   :  { %v2074_v4 = vpack.c.bf16 %v1424_v49, %v1423_v56  ;;  %v1004_v5 = vadd.f32 %v2857_v62, %v1003_v61  ;;  %v1005_v6 = vpop.f32.mrb[49].mxu1 }
 0x19d   :  { %v1006_v7 = vpop.f32.mrb[50].mxu1 }
 0x19e   :  { %2166 = vst [vmem:[#allocation7 + $0x58] sm:$0xff] %v2074_v4   ;;  %v1268_v8 = vadd.f32 %v1267_v11, %v1004_v5  ;;  %v1007_v59 = vadd.f32 %v2857_v62, %v1006_v7  ;;  %v1008_v9 = vpop.f32.mrb[51].mxu1 }
 0x1a0   :  { %v1271_v60 = vadd.f32 %v1270_v15, %v1007_v59  ;;  %v1425_v10 = vmax.f32 %v1268_v8, 0.0  ;;  %v1307_v25 = vpop.f32.mrb[68].mxu0 }
 0x1a1   :  { %v2303_v15 = vpop.f32.mrb[69].mxu0 }
 0x1a2   :  { %v1426_v3 = vmax.f32 %v1271_v60, 0.0  ;;  %v1310_v27 = vpop.f32.mrb[70].mxu0 }
 0x1a3   :  { %v1011_v13 = vpop.f32.mrb[52].mxu1  ;;  %v2304_v31 = vpop.f32.mrb[71].mxu0 }
 0x1a4   :  { %v2079_v19 = vpack.c.bf16 %v1426_v3, %v1425_v10  ;;  %v1012_v20 = vadd.f32 %v2857_v62, %v1011_v13  ;;  %v1013_v21 = vpop.f32.mrb[53].mxu1 }
 0x1a5   :  { %v1014_v22 = vpop.f32.mrb[54].mxu1 }
 0x1a6   :  { %2167 = vst [vmem:[#allocation7 + $0x60] sm:$0xff] %v2079_v19   ;;  %v1276_v23 = vadd.f32 %v1275_v26, %v1012_v20  ;;  %v1015_v11 = vadd.f32 %v2857_v62, %v1014_v22  ;;  %v1016_v24 = vpop.f32.mrb[55].mxu1 }
 0x1a8   :  { %v1279_v2 = vadd.f32 %v1278_v29, %v1015_v11  ;;  %v1427_v14 = vmax.f32 %v1276_v23, 0.0  ;;  %v1315_v40 = vpop.f32.mrb[72].mxu0 }
 0x1a9   :  { %v2307_v29 = vpop.f32.mrb[73].mxu0 }
 0x1aa   :  { %v1428_v17 = vmax.f32 %v1279_v2, 0.0  ;;  %v1318_v42 = vpop.f32.mrb[74].mxu0 }
 0x1ab   :  { %v1019_v18 = vpop.f32.mrb[56].mxu1  ;;  %v2308_v46 = vpop.f32.mrb[75].mxu0 }
 0x1ac   :  { %v2084_v33 = vpack.c.bf16 %v1428_v17, %v1427_v14  ;;  %v1020_v35 = vadd.f32 %v2857_v62, %v1019_v18  ;;  %v1021_v36 = vpop.f32.mrb[57].mxu1 }
 0x1ad   :  { %v1022_v37 = vpop.f32.mrb[58].mxu1 }
 0x1ae   :  { %2168 = vst [vmem:[#allocation7 + $0x68] sm:$0xff] %v2084_v33   ;;  %v1284_v38 = vadd.f32 %v1283_v41, %v1020_v35  ;;  %v1023_v26 = vadd.f32 %v2857_v62, %v1022_v37  ;;  %v1024_v39 = vpop.f32.mrb[59].mxu1 }
 0x1b0   :  { %v1287_v28 = vadd.f32 %v1286_v44, %v1023_v26  ;;  %v1429_v30 = vmax.f32 %v1284_v38, 0.0  ;;  %v1323_v55 = vpop.f32.mrb[76].mxu0 }
 0x1b1   :  { %v2311_v44 = vpop.f32.mrb[77].mxu0 }
 0x1b2   :  { %v1430_v32 = vmax.f32 %v1287_v28, 0.0  ;;  %v1326_v56 = vpop.f32.mrb[78].mxu0 }
 0x1b3   :  { %v1027_v34 = vpop.f32.mrb[60].mxu1  ;;  %v2312_v61 = vpop.f32.mrb[79].mxu0 }
 0x1b4   :  { %v2089_v48 = vpack.c.bf16 %v1430_v32, %v1429_v30  ;;  %v1028_v50 = vadd.f32 %v2857_v62, %v1027_v34  ;;  %v1029_v51 = vpop.f32.mrb[61].mxu1 }
 0x1b5   :  { %v1030_v52 = vpop.f32.mrb[62].mxu1 }
 0x1b6   :  { %2169 = vst [vmem:[#allocation7 + $0x70] sm:$0xff] %v2089_v48   ;;  %v1292_v53 = vadd.f32 %v1291_v57, %v1028_v50  ;;  %v1031_v41 = vadd.f32 %v2857_v62, %v1030_v52  ;;  %v1032_v54 = vpop.f32.mrb[63].mxu1 }
 0x1b8   :  { %v1295_v43 = vadd.f32 %v1294_v58, %v1031_v41  ;;  %v1431_v45 = vmax.f32 %v1292_v53, 0.0  ;;  %v1331_v9 = vpop.f32.mrb[80].mxu0 }
 0x1b9   :  { %v2315_v58 = vpop.f32.mrb[81].mxu0 }
 0x1ba   :  { %v1432_v47 = vmax.f32 %v1295_v43, 0.0  ;;  %v1334_v10 = vpop.f32.mrb[82].mxu0 }
 0x1bb   :  { %v1035_v49 = vpop.f32.mrb[64].mxu1  ;;  %v2316_v13 = vpop.f32.mrb[83].mxu0 }
 0x1bc   :  { %v2094_v0 = vpack.c.bf16 %v1432_v47, %v1431_v45  ;;  %v1036_v4 = vadd.f32 %v2857_v62, %v1035_v49  ;;  %v1037_v5 = vpop.f32.mrb[65].mxu1 }
 0x1bd   :  { %v1038_v6 = vpop.f32.mrb[66].mxu1 }
 0x1be   :  { %2170 = vst [vmem:[#allocation7 + $0x78] sm:$0xff] %v2094_v0   ;;  %v1300_v7 = vadd.f32 %v1299_v1, %v1036_v4  ;;  %v1039_v57 = vadd.f32 %v2857_v62, %v1038_v6  ;;  %v1040_v8 = vpop.f32.mrb[67].mxu1 }
 0x1c0   :  { %v1303_v59 = vadd.f32 %v1302_v12, %v1039_v57  ;;  %v1433_v60 = vmax.f32 %v1300_v7, 0.0  ;;  %v1339_v24 = vpop.f32.mrb[84].mxu0 }
 0x1c1   :  { %v2319_v12 = vpop.f32.mrb[85].mxu0 }
 0x1c2   :  { %v1434_v63 = vmax.f32 %v1303_v59, 0.0  ;;  %v1342_v14 = vpop.f32.mrb[86].mxu0 }
 0x1c3   :  { %v1043_v3 = vpop.f32.mrb[68].mxu1  ;;  %v2320_v18 = vpop.f32.mrb[87].mxu0 }
 0x1c4   :  { %v2099_v16 = vpack.c.bf16 %v1434_v63, %v1433_v60  ;;  %v1044_v19 = vadd.f32 %v2857_v62, %v1043_v3  ;;  %v1045_v20 = vpop.f32.mrb[69].mxu1 }
 0x1c5   :  { %v1046_v21 = vpop.f32.mrb[70].mxu1 }
 0x1c6   :  { %2171 = vst [vmem:[#allocation7 + $0x80] sm:$0xff] %v2099_v16   ;;  %v1308_v22 = vadd.f32 %v1307_v25, %v1044_v19  ;;  %v1047_v1 = vadd.f32 %v2857_v62, %v1046_v21  ;;  %v1048_v23 = vpop.f32.mrb[71].mxu1 }
 0x1c8   :  { %v1311_v11 = vadd.f32 %v1310_v27, %v1047_v1  ;;  %v1435_v2 = vmax.f32 %v1308_v22, 0.0  ;;  %v1347_v39 = vpop.f32.mrb[88].mxu0 }
 0x1c9   :  { %v2323_v27 = vpop.f32.mrb[89].mxu0 }
 0x1ca   :  { %v1436_v15 = vmax.f32 %v1311_v11, 0.0  ;;  %v1350_v30 = vpop.f32.mrb[90].mxu0 }
 0x1cb   :  { %v1051_v17 = vpop.f32.mrb[72].mxu1  ;;  %v2324_v34 = vpop.f32.mrb[91].mxu0 }
 0x1cc   :  { %v2104_v31 = vpack.c.bf16 %v1436_v15, %v1435_v2  ;;  %v1052_v33 = vadd.f32 %v2857_v62, %v1051_v17  ;;  %v1053_v35 = vpop.f32.mrb[73].mxu1 }
 0x1cd   :  { %v1054_v36 = vpop.f32.mrb[74].mxu1 }
 0x1ce   :  { %2172 = vst [vmem:[#allocation7 + $0x88] sm:$0xff] %v2104_v31   ;;  %v1316_v37 = vadd.f32 %v1315_v40, %v1052_v33  ;;  %v1055_v25 = vadd.f32 %v2857_v62, %v1054_v36  ;;  %v1056_v38 = vpop.f32.mrb[75].mxu1 }
 0x1d0   :  { %v1319_v26 = vadd.f32 %v1318_v42, %v1055_v25  ;;  %v1437_v28 = vmax.f32 %v1316_v37, 0.0  ;;  %v1355_v54 = vpop.f32.mrb[92].mxu0 }
 0x1d1   :  { %v2327_v42 = vpop.f32.mrb[93].mxu0 }
 0x1d2   :  { %v1438_v29 = vmax.f32 %v1319_v26, 0.0  ;;  %v1358_v45 = vpop.f32.mrb[94].mxu0 }
 0x1d3   :  { %v1059_v32 = vpop.f32.mrb[76].mxu1  ;;  %v2328_v49 = vpop.f32.mrb[95].mxu0 }
 0x1d4   :  { %v2109_v46 = vpack.c.bf16 %v1438_v29, %v1437_v28  ;;  %v1060_v48 = vadd.f32 %v2857_v62, %v1059_v32  ;;  %v1061_v50 = vpop.f32.mrb[77].mxu1 }
 0x1d5   :  { %v1062_v51 = vpop.f32.mrb[78].mxu1 }
 0x1d6   :  { %2173 = vst [vmem:[#allocation7 + $0x90] sm:$0xff] %v2109_v46   ;;  %v1324_v52 = vadd.f32 %v1323_v55, %v1060_v48  ;;  %v1063_v40 = vadd.f32 %v2857_v62, %v1062_v51  ;;  %v1064_v53 = vpop.f32.mrb[79].mxu1 }
 0x1d8   :  { %v1327_v41 = vadd.f32 %v1326_v56, %v1063_v40  ;;  %v1439_v43 = vmax.f32 %v1324_v52, 0.0  ;;  %v1363_v8 = vpop.f32.mrb[96].mxu0 }
 0x1d9   :  { %v2331_v56 = vpop.f32.mrb[97].mxu0 }
 0x1da   :  { %v1440_v44 = vmax.f32 %v1327_v41, 0.0  ;;  %v1366_v60 = vpop.f32.mrb[98].mxu0 }
 0x1db   :  { %v1067_v47 = vpop.f32.mrb[80].mxu1  ;;  %v2332_v3 = vpop.f32.mrb[99].mxu0 }
 0x1dc   :  { %v2114_v61 = vpack.c.bf16 %v1440_v44, %v1439_v43  ;;  %v1068_v0 = vadd.f32 %v2857_v62, %v1067_v47  ;;  %v1069_v4 = vpop.f32.mrb[81].mxu1 }
 0x1dd   :  { %v1070_v5 = vpop.f32.mrb[82].mxu1 }
 0x1de   :  { %2174 = vst [vmem:[#allocation7 + $0x98] sm:$0xff] %v2114_v61   ;;  %v1332_v6 = vadd.f32 %v1331_v9, %v1068_v0  ;;  %v1071_v55 = vadd.f32 %v2857_v62, %v1070_v5  ;;  %v1072_v7 = vpop.f32.mrb[83].mxu1 }
 0x1e0   :  { %v1335_v57 = vadd.f32 %v1334_v10, %v1071_v55  ;;  %v1441_v59 = vmax.f32 %v1332_v6, 0.0  ;;  %v1371_v23 = vpop.f32.mrb[100].mxu0 }
 0x1e1   :  { %v2335_v10 = vpop.f32.mrb[101].mxu0 }
 0x1e2   :  { %v1442_v58 = vmax.f32 %v1335_v57, 0.0  ;;  %v1374_v2 = vpop.f32.mrb[102].mxu0 }
 0x1e3   :  { %v1075_v63 = vpop.f32.mrb[84].mxu1  ;;  %v2336_v17 = vpop.f32.mrb[103].mxu0 }
 0x1e4   :  { %v2119_v13 = vpack.c.bf16 %v1442_v58, %v1441_v59  ;;  %v1076_v16 = vadd.f32 %v2857_v62, %v1075_v63  ;;  %v1077_v19 = vpop.f32.mrb[85].mxu1 }
 0x1e5   :  { %v1078_v20 = vpop.f32.mrb[86].mxu1 }
 0x1e6   :  { %2175 = vst [vmem:[#allocation7 + $0xa0] sm:$0xff] %v2119_v13   ;;  %v1340_v21 = vadd.f32 %v1339_v24, %v1076_v16  ;;  %v1079_v9 = vadd.f32 %v2857_v62, %v1078_v20  ;;  %v1080_v22 = vpop.f32.mrb[87].mxu1 }
 0x1e8   :  { %v1343_v1 = vadd.f32 %v1342_v14, %v1079_v9  ;;  %v1443_v11 = vmax.f32 %v1340_v21, 0.0  ;;  %v1379_v38 = vpop.f32.mrb[104].mxu0 }
 0x1e9   :  { %v2339_v14 = vpop.f32.mrb[105].mxu0 }
 0x1ea   :  { %v1444_v12 = vmax.f32 %v1343_v1, 0.0  ;;  %v1382_v28 = vpop.f32.mrb[106].mxu0 }
 0x1eb   :  { %v1083_v15 = vpop.f32.mrb[88].mxu1  ;;  %v2340_v32 = vpop.f32.mrb[107].mxu0 }
 0x1ec   :  { %v2124_v18 = vpack.c.bf16 %v1444_v12, %v1443_v11  ;;  %v1084_v31 = vadd.f32 %v2857_v62, %v1083_v15  ;;  %v1085_v33 = vpop.f32.mrb[89].mxu1 }
 0x1ed   :  { %v1086_v35 = vpop.f32.mrb[90].mxu1 }
 0x1ee   :  { %2176 = vst [vmem:[#allocation7 + $0xa8] sm:$0xff] %v2124_v18   ;;  %v1348_v36 = vadd.f32 %v1347_v39, %v1084_v31  ;;  %v1087_v24 = vadd.f32 %v2857_v62, %v1086_v35  ;;  %v1088_v37 = vpop.f32.mrb[91].mxu1 }
 0x1f0   :  { %v1351_v25 = vadd.f32 %v1350_v30, %v1087_v24  ;;  %v1445_v26 = vmax.f32 %v1348_v36, 0.0  ;;  %v1387_v53 = vpop.f32.mrb[108].mxu0 }
 0x1f1   :  { %v2343_v30 = vpop.f32.mrb[109].mxu0 }
 0x1f2   :  { %v1446_v27 = vmax.f32 %v1351_v25, 0.0  ;;  %v1390_v43 = vpop.f32.mrb[110].mxu0 }
 0x1f3   :  { %v1091_v29 = vpop.f32.mrb[92].mxu1  ;;  %v2344_v47 = vpop.f32.mrb[111].mxu0 }
 0x1f4   :  { %v2129_v34 = vpack.c.bf16 %v1446_v27, %v1445_v26  ;;  %v1092_v46 = vadd.f32 %v2857_v62, %v1091_v29  ;;  %v1093_v48 = vpop.f32.mrb[93].mxu1 }
 0x1f5   :  { %v1094_v50 = vpop.f32.mrb[94].mxu1 }
 0x1f6   :  { %2177 = vst [vmem:[#allocation7 + $0xb0] sm:$0xff] %v2129_v34   ;;  %v1356_v51 = vadd.f32 %v1355_v54, %v1092_v46  ;;  %v1095_v39 = vadd.f32 %v2857_v62, %v1094_v50  ;;  %v1096_v52 = vpop.f32.mrb[95].mxu1 }
 0x1f8   :  { %v1359_v40 = vadd.f32 %v1358_v45, %v1095_v39  ;;  %v1447_v41 = vmax.f32 %v1356_v51, 0.0  ;;  %v1395_v7 = vpop.f32.mrb[112].mxu0 }
 0x1f9   :  { %v2347_v45 = vpop.f32.mrb[113].mxu0 }
 0x1fa   :  { %v1448_v42 = vmax.f32 %v1359_v40, 0.0  ;;  %v1398_v59 = vpop.f32.mrb[114].mxu0 }
 0x1fb   :  { %v1099_v44 = vpop.f32.mrb[96].mxu1  ;;  %v2348_v63 = vpop.f32.mrb[115].mxu0 }
 0x1fc   :  { %v2134_v49 = vpack.c.bf16 %v1448_v42, %v1447_v41  ;;  %v1100_v61 = vadd.f32 %v2857_v62, %v1099_v44  ;;  %v1101_v0 = vpop.f32.mrb[97].mxu1 }
 0x1fd   :  { %v1102_v4 = vpop.f32.mrb[98].mxu1 }
 0x1fe   :  { %2178 = vst [vmem:[#allocation7 + $0xb8] sm:$0xff] %v2134_v49   ;;  %v1364_v5 = vadd.f32 %v1363_v8, %v1100_v61  ;;  %v1103_v54 = vadd.f32 %v2857_v62, %v1102_v4  ;;  %v1104_v6 = vpop.f32.mrb[99].mxu1 }
 0x200   :  { %v1367_v55 = vadd.f32 %v1366_v60, %v1103_v54  ;;  %v1449_v57 = vmax.f32 %v1364_v5, 0.0 }
 0x202   :  { %v1450_v56 = vmax.f32 %v1367_v55, 0.0 }
 0x203   :  { %v1107_v58 = vpop.f32.mrb[100].mxu1 }
 0x204   :  { %v2139_v3 = vpack.c.bf16 %v1450_v56, %v1449_v57  ;;  %v1108_v13 = vadd.f32 %v2857_v62, %v1107_v58  ;;  %v1109_v16 = vpop.f32.mrb[101].mxu1 }
 0x205   :  { %v1110_v19 = vpop.f32.mrb[102].mxu1 }
 0x206   :  { %2179 = vst [vmem:[#allocation7 + $0xc0] sm:$0xff] %v2139_v3   ;;  %v1372_v20 = vadd.f32 %v1371_v23, %v1108_v13  ;;  %v1111_v8 = vadd.f32 %v2857_v62, %v1110_v19  ;;  %v1112_v21 = vpop.f32.mrb[103].mxu1 }
 0x208   :  { %v1375_v9 = vadd.f32 %v1374_v2, %v1111_v8  ;;  %v1451_v22 = vmax.f32 %v1372_v20, 0.0 }
 0x20a   :  { %v1452_v60 = vmax.f32 %v1375_v9, 0.0 }
 0x20b   :  { %v1115_v1 = vpop.f32.mrb[104].mxu1 }
 0x20c   :  { %v2144_v10 = vpack.c.bf16 %v1452_v60, %v1451_v22  ;;  %v1116_v11 = vadd.f32 %v2857_v62, %v1115_v1  ;;  %v1117_v12 = vpop.f32.mrb[105].mxu1 }
 0x20d   :  { %v1118_v15 = vpop.f32.mrb[106].mxu1 }
 0x20e   :  { %2180 = vst [vmem:[#allocation7 + $0xc8] sm:$0xff] %v2144_v10   ;;  %v1380_v17 = vadd.f32 %v1379_v38, %v1116_v11  ;;  %v1119_v18 = vadd.f32 %v2857_v62, %v1118_v15  ;;  %v1120_v31 = vpop.f32.mrb[107].mxu1 }
 0x210   :  { %v1383_v33 = vadd.f32 %v1382_v28, %v1119_v18  ;;  %v1453_v35 = vmax.f32 %v1380_v17, 0.0 }
 0x212   :  { %v1454_v23 = vmax.f32 %v1383_v33, 0.0 }
 0x213   :  { %v1123_v36 = vpop.f32.mrb[108].mxu1 }
 0x214   :  { %v2149_v24 = vpack.c.bf16 %v1454_v23, %v1453_v35  ;;  %v1124_v2 = vadd.f32 %v2857_v62, %v1123_v36  ;;  %v1125_v37 = vpop.f32.mrb[109].mxu1 }
 0x215   :  { %v1126_v25 = vpop.f32.mrb[110].mxu1 }
 0x216   :  { %2181 = vst [vmem:[#allocation7 + $0xd0] sm:$0xff] %v2149_v24   ;;  %v1388_v14 = vadd.f32 %v1387_v53, %v1124_v2  ;;  %v1127_v26 = vadd.f32 %v2857_v62, %v1126_v25  ;;  %v1128_v27 = vpop.f32.mrb[111].mxu1 }
 0x218   :  { %v1391_v29 = vadd.f32 %v1390_v43, %v1127_v26  ;;  %v1455_v32 = vmax.f32 %v1388_v14, 0.0 }
 0x21a   :  { %v1456_v38 = vmax.f32 %v1391_v29, 0.0 }
 0x21b   :  { %v1131_v34 = vpop.f32.mrb[112].mxu1 }
 0x21c   :  { %v2154_v46 = vpack.c.bf16 %v1456_v38, %v1455_v32  ;;  %v1132_v28 = vadd.f32 %v2857_v62, %v1131_v34  ;;  %v1133_v48 = vpop.f32.mrb[113].mxu1 }
 0x21d   :  { %v1134_v50 = vpop.f32.mrb[114].mxu1 }
 0x21e   :  { %2182 = vst [vmem:[#allocation7 + $0xd8] sm:$0xff] %v2154_v46   ;;  %v1396_v51 = vadd.f32 %v1395_v7, %v1132_v28  ;;  %v1135_v39 = vpop.f32.mrb[115].mxu1 }
 0x220   :  { %v1457_v52 = vmax.f32 %v1396_v51, 0.0 }
 0x222   :  { %v2015_v40 = vpack.c.bf16 %v1457_v52, %v1457_v52 }
 0x224   :  { %1743 = vst [vmem:[#allocation7 + $0xe0] sm:$0x1] %v2015_v40 }
 0x225   :  { %2667 = shalt.err (!%p2664_p6)
}
 0x226   :  { %s2668_s17 = scalar_lea.hbm %s2941_s3, 3648 }
 0x227   :  { %p2669_p7 = scmp.ne.s32.totalorder %s2941_s3, %s2668_s17  ;;  %p2672_p8 = scmp.lt.u32.totalorder %s2668_s17, %s2941_s3 }
 0x229   :  { %p2674_p9 = pnand %p2672_p8, %p2669_p7 }
 0x22b   :  { %2677 = shalt.err (!%p2674_p9)
}
 0x22c   :  { %1755 = dma.vmem_to_hbm [thread:$0]  %s1750_s13, 3648, %s2941_s3, [#allocation4], %s2688_s0, %s2688_s0, %s2689_s9  }
 0x22d   :  { %2682 = dma.done.wait [#allocation4], 3648  }
 0x22e   :  { %2683 = vsyncadd [#allocation4], 4294963648 }
 0x22f   :  { %1759 = vsyncpa [#allocation3], 1 }
 0x230   :  { %1760 = vsyncpa [#allocation6], 1 }
 0x231   :  { %1761 = vsyncpa [#allocation4], 1 }

</bundles_post_ra>
